<compile_context>
chip_gen: v6e
topology: v6e:2x2x1
jax: 0.10.0
libtpu: 0.0.40
codegen_flags: <defaults>
</compile_context>

<pallas_src>
import functools
import math

import jax
import jax.numpy as jnp
from jax.experimental import pallas as pl
from jax.experimental.pallas import tpu as pltpu

F32 = jnp.float32
BN_EPS = 1e-5
LN_EPS = 1e-5

_CPARAMS = pltpu.CompilerParams(
    dimension_semantics=("parallel",),
    vmem_limit_bytes=32 * 1024 * 1024,
)


def _prelu(x, alpha):
    return jnp.where(x >= 0, x, alpha * x)


def _round_up(x, m):
    return ((x + m - 1) // m) * m


def _pad_rows(x, b_pad):
    b = x.shape[0]
    if b == b_pad:
        return x
    return jnp.pad(x, ((0, b_pad - b),) + ((0, 0),) * (x.ndim - 1))


# -------------------------------------------------------------------------
# Kernel 1: MultiChannelProj -> LayerNorm([C, hid]) -> PReLU   (fused)
#   flat layout: x is (tb, C*n), output is (tb, C*m); channel c lives on
#   lanes [c*m, (c+1)*m).
# -------------------------------------------------------------------------
def _mcp_ln_prelu_kernel(x_ref, w_ref, b_ref, lnw_ref, lnb_ref, alpha_ref,
                         o_ref, *, C, n, m, eps):
    x = x_ref[...]                                    # (tb, C*n)
    w = w_ref[...]                                    # (C, n, m)
    b = b_ref[0]                                      # (C*m,)
    ys = []
    for c in range(C):                                # static, small channel count
        yc = jnp.dot(x[:, c * n:(c + 1) * n], w[c],
                     preferred_element_type=F32) + b[c * m:(c + 1) * m]
        ys.append(yc)
    y = jnp.concatenate(ys, axis=-1)                  # (tb, C*m), lane concat
    # LayerNorm over the full [C, hid] (= C*m lanes) per row -> lane reduce only
    mu = jnp.mean(y, axis=-1, keepdims=True)
    var = jnp.mean(jnp.square(y - mu), axis=-1, keepdims=True)
    yn = (y - mu) * jax.lax.rsqrt(var + eps)
    yn = yn * lnw_ref[0] + lnb_ref[0]
    o_ref[...] = _prelu(yn, alpha_ref[0])


def mcp_ln_prelu(x, w, b, ln_w, ln_b, alpha, *, tb):
    b_pad = x.shape[0]
    C, n, m = w.shape
    return pl.pallas_call(
        functools.partial(_mcp_ln_prelu_kernel, C=C, n=n, m=m, eps=LN_EPS),
        out_shape=jax.ShapeDtypeStruct((b_pad, C * m), F32),
        grid=(b_pad // tb,),
        in_specs=[
            pl.BlockSpec((tb, C * n), lambda i: (i, 0)),
            pl.BlockSpec((C, n, m), lambda i: (0, 0, 0)),
            pl.BlockSpec((1, C * m), lambda i: (0, 0)),
            pl.BlockSpec((1, C * m), lambda i: (0, 0)),
            pl.BlockSpec((1, C * m), lambda i: (0, 0)),
            pl.BlockSpec(memory_space=pltpu.MemorySpace.SMEM),
        ],
        out_specs=pl.BlockSpec((tb, C * m), lambda i: (i, 0)),
        compiler_params=_CPARAMS,
    )(x, w, b, ln_w, ln_b, alpha)


# -------------------------------------------------------------------------
# Kernel 2: HeteroSelfAttention on the flat (tb, C*hid) layout.
#   Q/K/V projections fused into one matmul per channel (MXU). The C x C x H
#   score / leaky-relu / softmax / weighted-sum math (C = #meta-paths, tiny)
#   is done with VPU broadcast multiplies + lane reductions -- no tiny MXU
#   batched matmuls, no head-wise relayouts.
# -------------------------------------------------------------------------
def _attention_kernel(x_ref, wqkv_ref, bqkv_ref, gamma_ref, o_ref,
                      *, C, hid, qk, num_heads):
    dq = qk // num_heads
    dv = hid // num_heads
    scale = 1.0 / math.sqrt(dq)
    gamma = gamma_ref[0]

    x = x_ref[...]                                    # (tb, C*hid)
    wqkv = wqkv_ref[...]                              # (hid, 2*qk + hid)
    bqkv = bqkv_ref[0]                                # (2*qk + hid,)

    qs, ks, vs = [], [], []
    for c in range(C):
        xc = x[:, c * hid:(c + 1) * hid]
        p = jnp.dot(xc, wqkv, preferred_element_type=F32) + bqkv
        qs.append(p[:, :qk])
        ks.append(p[:, qk:2 * qk])
        vs.append(p[:, 2 * qk:])

    out_chunks = []
    for i in range(C):
        # leaky-relu'd scaled scores, scores[j][h] has shape (tb, 1)
        scores = []
        for j in range(C):
            prod = qs[i] * ks[j]                      # (tb, qk)
            hs = []
            for h in range(num_heads):
                s = jnp.sum(prod[:, h * dq:(h + 1) * dq],
                            axis=-1, keepdims=True) * scale
                hs.append(jnp.where(s >= 0, s, 0.2 * s))   # LeakyReLU(0.2)
            scores.append(hs)
        head_outs = []
        for h in range(num_heads):
            col = [scores[j][h] for j in range(C)]
            mx = col[0]
            for j in range(1, C):
                mx = jnp.maximum(mx, col[j])
            ex = [jnp.exp(c_ - mx) for c_ in col]
            denom = ex[0]
            for j in range(1, C):
                denom = denom + ex[j]
            inv = 1.0 / denom
            acc = (ex[0] * inv) * vs[0][:, h * dv:(h + 1) * dv]
            for j in range(1, C):
                acc = acc + (ex[j] * inv) * vs[j][:, h * dv:(h + 1) * dv]
            head_outs.append(acc)                     # (tb, dv)
        attn_i = jnp.concatenate(head_outs, axis=-1)  # (tb, hid)
        out_chunks.append(gamma * attn_i + x[:, i * hid:(i + 1) * hid])
    o_ref[...] = jnp.concatenate(out_chunks, axis=-1)


def hetero_attention(x, wqkv, bqkv, gamma, *, C, hid, qk, num_heads, tb):
    b_pad = x.shape[0]
    proj = 2 * qk + hid
    return pl.pallas_call(
        functools.partial(_attention_kernel, C=C, hid=hid, qk=qk,
                          num_heads=num_heads),
        out_shape=jax.ShapeDtypeStruct((b_pad, C * hid), F32),
        grid=(b_pad // tb,),
        in_specs=[
            pl.BlockSpec((tb, C * hid), lambda i: (i, 0)),
            pl.BlockSpec((hid, proj), lambda i: (0, 0)),
            pl.BlockSpec((1, proj), lambda i: (0, 0)),
            pl.BlockSpec(memory_space=pltpu.MemorySpace.SMEM),
        ],
        out_specs=pl.BlockSpec((tb, C * hid), lambda i: (i, 0)),
        compiler_params=_CPARAMS,
    )(x, wqkv, bqkv, gamma)


# -------------------------------------------------------------------------
# Kernel 3: fused tail
#   merge_channels(x) + residual(tgt) -> PReLU
#   -> Lin -> BN -> PReLU -> Lin -> BN              (output_layers)
#   + label_residual(label_emb)  (Lin/BN/PReLU x3 -> Lin+bias)
#   The num_classes output dim is padded to 128 lanes inside the kernel.
# -------------------------------------------------------------------------
def _tail_kernel(x_ref, tgt_ref, lab_ref, merge_w_ref, merge_b_ref, res_w_ref,
                 out1_w_ref, out2_w_ref, lab1_w_ref, lab2_w_ref, lab3_w_ref,
                 lab4_w_ref, lab4_b_ref, alphas_ref, o_ref, *, bn_scale):
    a_main = alphas_ref[0]
    a_out1 = alphas_ref[1]
    a_lab1 = alphas_ref[2]
    a_lab2 = alphas_ref[3]
    a_lab3 = alphas_ref[4]

    h = jnp.dot(x_ref[...], merge_w_ref[...],
                preferred_element_type=F32) + merge_b_ref[0]
    h = h + jnp.dot(tgt_ref[...], res_w_ref[...], preferred_element_type=F32)
    h = _prelu(h, a_main)                                        # self.prelu
    h = _prelu(jnp.dot(h, out1_w_ref[...],
                       preferred_element_type=F32) * bn_scale, a_out1)
    out = jnp.dot(h, out2_w_ref[...], preferred_element_type=F32) * bn_scale

    y = _prelu(jnp.dot(lab_ref[...], lab1_w_ref[...],
                       preferred_element_type=F32) * bn_scale, a_lab1)
    y = _prelu(jnp.dot(y, lab2_w_ref[...],
                       preferred_element_type=F32) * bn_scale, a_lab2)
    y = _prelu(jnp.dot(y, lab3_w_ref[...],
                       preferred_element_type=F32) * bn_scale, a_lab3)
    y = jnp.dot(y, lab4_w_ref[...], preferred_element_type=F32) + lab4_b_ref[0]

    o_ref[...] = out + y


def fused_tail(x, tgt, lab, merge_w, merge_b, res_w, out1_w, out2_w_p,
               lab1_w, lab2_w, lab3_w, lab4_w_p, lab4_b_p, alphas, *, tb):
    b_pad, ch = x.shape
    in_dim = tgt.shape[1]
    ncls = lab.shape[1]
    hid = merge_w.shape[1]
    npad = out2_w_p.shape[1]

    def full2(shape):
        return pl.BlockSpec(shape, lambda i: (0, 0))

    return pl.pallas_call(
        functools.partial(_tail_kernel,
                          bn_scale=1.0 / math.sqrt(1.0 + BN_EPS)),
        out_shape=jax.ShapeDtypeStruct((b_pad, npad), F32),
        grid=(b_pad // tb,),
        in_specs=[
            pl.BlockSpec((tb, ch), lambda i: (i, 0)),
            pl.BlockSpec((tb, in_dim), lambda i: (i, 0)),
            pl.BlockSpec((tb, ncls), lambda i: (i, 0)),
            full2((ch, hid)),
            full2((1, hid)),
            full2((in_dim, hid)),
            full2((hid, hid)),
            full2((hid, npad)),
            full2((ncls, hid)),
            full2((hid, hid)),
            full2((hid, hid)),
            full2((hid, npad)),
            full2((1, npad)),
            pl.BlockSpec(memory_space=pltpu.MemorySpace.SMEM),
        ],
        out_specs=pl.BlockSpec((tb, npad), lambda i: (i, 0)),
        compiler_params=_CPARAMS,
    )(x, tgt, lab, merge_w, merge_b, res_w, out1_w, out2_w_p,
      lab1_w, lab2_w, lab3_w, lab4_w_p, lab4_b_p, alphas)


# -------------------------------------------------------------------------
# Full forward (3 pallas_calls; only cheap packing / padding in plain JAX)
# -------------------------------------------------------------------------
def decoupled_hcoat_forward(params, batch_feats, feat_order, tgt_type,
                            label_emb, *, num_heads, tb_max=512):
    B = label_emb.shape[0]
    C = len(feat_order)
    hid = params['merge_w'].shape[1]
    qk = params['wq'].shape[1]
    ncls = params['out2_w'].shape[1]

    # explicit meta-path ordering (matches torch.stack(list(dict.values())))
    x = jnp.concatenate([batch_feats[k] for k in feat_order], axis=1)  # (B, C*in)
    tgt = batch_feats[tgt_type]

    # batch tile: as large as possible (<= tb_max, multiple of 8); pad B to a
    # multiple of tb so no rows are dropped by the grid.
    tb = min(tb_max, _round_up(B, 8))
    b_pad = _round_up(B, tb)
    x = _pad_rows(x, b_pad)
    tgt = _pad_rows(tgt, b_pad)
    lab = _pad_rows(label_emb, b_pad)

    # feat_layers: (MCP -> LN([C,hid]) -> PReLU -> Drop) x 2   (Drop = id)
    x = mcp_ln_prelu(x, params['mcp1_w'], params['mcp1_b'],
                     params['ln1_w'], params['ln1_b'], params['prelu1'], tb=tb)
    x = mcp_ln_prelu(x, params['mcp2_w'], params['mcp2_b'],
                     params['ln2_w'], params['ln2_b'], params['prelu2'], tb=tb)

    # att_layers (Q/K/V weights packed into a single per-channel matmul)
    wqkv = jnp.concatenate([params['wq'], params['wk'], params['wv']], axis=1)
    bqkv = jnp.concatenate([params['bq'], params['bk'], params['bv']], axis=1)
    x = hetero_attention(x, wqkv, bqkv, params['gamma'],
                         C=C, hid=hid, qk=qk, num_heads=num_heads, tb=tb)

    # fused tail: merge+residual+prelu -> output_layers -> + label_residual
    npad = _round_up(ncls, 128)                      # lane-dense final store
    out2_w_p = jnp.pad(params['out2_w'], ((0, 0), (0, npad - ncls)))
    lab4_w_p = jnp.pad(params['lab4_w'], ((0, 0), (0, npad - ncls)))
    lab4_b_p = jnp.pad(params['lab4_b'], ((0, 0), (0, npad - ncls)))
    alphas = jnp.concatenate([params['prelu_main'], params['prelu_out1'],
                              params['prelu_lab1'], params['prelu_lab2'],
                              params['prelu_lab3']])
    out = fused_tail(x, tgt, lab, params['merge_w'], params['merge_b'],
                     params['res_w'], params['out1_w'], out2_w_p,
                     params['lab1_w'], params['lab2_w'], params['lab3_w'],
                     lab4_w_p, lab4_b_p, alphas, tb=tb)
    return out[:B, :ncls]


# -------------------------------------------------------------------------
# Deterministic parameter construction (shapes per module __init__);
# biases / LN affines are stored flat (1, C*hid) to match the lane layout.
# -------------------------------------------------------------------------
def make_params(key, *, C, in_dim, hid, num_classes):
    gain = math.sqrt(2.0)  # calculate_gain('relu')

    def xavier(k, shape):
        fan_in, fan_out = shape[-2], shape[-1]
        a = gain * math.sqrt(2.0 / (fan_in + fan_out)) * math.sqrt(3.0)
        return jax.random.uniform(k, shape, F32, -a, a)

    ks = iter(jax.random.split(key, 32))
    qk = hid // 8
    return {
        # feat_layers
        'mcp1_w': xavier(next(ks), (C, in_dim, hid)),
        'mcp1_b': jnp.zeros((1, C * hid), F32),
        'ln1_w': jnp.ones((1, C * hid), F32),
        'ln1_b': jnp.zeros((1, C * hid), F32),
        'prelu1': jnp.full((1,), 0.25, F32),
        'mcp2_w': xavier(next(ks), (C, hid, hid)),
        'mcp2_b': jnp.zeros((1, C * hid), F32),
        'ln2_w': jnp.ones((1, C * hid), F32),
        'ln2_b': jnp.zeros((1, C * hid), F32),
        'prelu2': jnp.full((1,), 0.25, F32),
        # attention
        'wq': xavier(next(ks), (hid, qk)), 'bq': jnp.zeros((1, qk), F32),
        'wk': xavier(next(ks), (hid, qk)), 'bk': jnp.zeros((1, qk), F32),
        'wv': xavier(next(ks), (hid, hid)), 'bv': jnp.zeros((1, hid), F32),
        'gamma': jnp.zeros((1,), F32),               # torch init: gamma = 0.0
        # merge / residual / main prelu
        'merge_w': xavier(next(ks), (C * hid, hid)),
        'merge_b': jnp.zeros((1, hid), F32),
        'res_w': xavier(next(ks), (in_dim, hid)),
        'prelu_main': jnp.full((1,), 0.25, F32),
        # output_layers
        'out1_w': xavier(next(ks), (hid, hid)),
        'prelu_out1': jnp.full((1,), 0.25, F32),
        'out2_w': xavier(next(ks), (hid, num_classes)),
        # label_residual
        'lab1_w': xavier(next(ks), (num_classes, hid)),
        'prelu_lab1': jnp.full((1,), 0.25, F32),
        'lab2_w': xavier(next(ks), (hid, hid)),
        'prelu_lab2': jnp.full((1,), 0.25, F32),
        'lab3_w': xavier(next(ks), (hid, hid)),
        'prelu_lab3': jnp.full((1,), 0.25, F32),
        'lab4_w': xavier(next(ks), (hid, num_classes)),
        'lab4_b': jnp.zeros((1, num_classes), F32),
    }


if __name__ == "__main__":
    B = 16          # nodes in the mini-batch
    C = 4           # num_feats / num_paths (meta-path channels)
    IN_DIM = 32
    HID = 64
    NUM_CLASSES = 8
    HEADS = 2       # HID % (4*HEADS) == 0

    key = jax.random.PRNGKey(0)
    kp, kf, kl = jax.random.split(key, 3)
    params = make_params(kp, C=C, in_dim=IN_DIM, hid=HID,
                         num_classes=NUM_CLASSES)

    feat_order = [f"mp{i}" for i in range(C)]        # explicit channel order
    fks = jax.random.split(kf, C)
    batch_feats = {k: jax.random.normal(fks[i], (B, IN_DIM), F32)
                   for i, k in enumerate(feat_order)}
    tgt_type = feat_order[0]
    label_emb = jax.random.normal(kl, (B, NUM_CLASSES), F32)

    out = decoupled_hcoat_forward(params, batch_feats, feat_order, tgt_type,
                                  label_emb, num_heads=HEADS, tb_max=512)
    out = jax.block_until_ready(out)
    assert out.shape == (B, NUM_CLASSES) and out.dtype == F32
    assert bool(jnp.all(jnp.isfinite(out)))
    print("KERNEL_OK")
</pallas_src>

<mosaic_0001>
module attributes {stable_mosaic.version = 11 : i64} {
  func.func @_mcp_ln_prelu_kernel(%arg0: i32, %arg1: memref<16x128xf32, #tpu.memory_space<vmem>>, %arg2: memref<4x32x64xf32, #tpu.memory_space<vmem>>, %arg3: memref<1x256xf32, #tpu.memory_space<vmem>>, %arg4: memref<1x256xf32, #tpu.memory_space<vmem>>, %arg5: memref<1x256xf32, #tpu.memory_space<vmem>>, %arg6: memref<1xf32, #tpu.memory_space<smem>>, %arg7: memref<16x256xf32, #tpu.memory_space<vmem>>) attributes {dimension_semantics = [#tpu.dimension_semantics<parallel>], iteration_bounds = array<i64: 1>, scalar_prefetch = 0 : i64, scratch_operands = 0 : i64, tpu.core_type = #tpu.core_type<tc>, window_params = [{transform_indices = @transform_0, window_bounds = array<i64: 16, 128>}, {pipeline_mode = #tpu.pipeline_mode<synchronous>, transform_indices = @transform_1, window_bounds = array<i64: 4, 32, 64>}, {pipeline_mode = #tpu.pipeline_mode<synchronous>, transform_indices = @transform_2, window_bounds = array<i64: 1, 256>}, {pipeline_mode = #tpu.pipeline_mode<synchronous>, transform_indices = @transform_3, window_bounds = array<i64: 1, 256>}, {pipeline_mode = #tpu.pipeline_mode<synchronous>, transform_indices = @transform_4, window_bounds = array<i64: 1, 256>}, {transform_indices = @transform_5, window_bounds = array<i64: 1>}, {transform_indices = @transform_6, window_bounds = array<i64: 16, 256>}]} {
    %c0 = arith.constant 0 : index
    %c0_0 = arith.constant 0 : index
    %0 = vector.load %arg1[%c0, %c0_0] : memref<16x128xf32, #tpu.memory_space<vmem>>, vector<16x128xf32>
    %c0_1 = arith.constant 0 : index
    %c0_2 = arith.constant 0 : index
    %c0_3 = arith.constant 0 : index
    %1 = vector.load %arg2[%c0_1, %c0_2, %c0_3] : memref<4x32x64xf32, #tpu.memory_space<vmem>>, vector<4x32x64xf32>
    %c0_4 = arith.constant 0 : index
    %c0_5 = arith.constant 0 : index
    %2 = vector.load %arg3[%c0_4, %c0_5] : memref<1x256xf32, #tpu.memory_space<vmem>>, vector<1x256xf32>
    %3 = vector.shape_cast %2 : vector<1x256xf32> to vector<256xf32>
    %4 = vector.extract_strided_slice %0 {offsets = [0, 0], sizes = [16, 32], strides = [1, 1]} : vector<16x128xf32> to vector<16x32xf32>
    %5 = vector.extract_strided_slice %1 {offsets = [0, 0, 0], sizes = [1, 32, 64], strides = [1, 1, 1]} : vector<4x32x64xf32> to vector<1x32x64xf32>
    %6 = vector.shape_cast %5 : vector<1x32x64xf32> to vector<32x64xf32>
    %cst = arith.constant dense<0.000000e+00> : vector<16x64xf32>
    %7 = tpu.matmul %4, %6, %cst {dimension_numbers = #tpu.dot_dimension_numbers<[1], [0], [0], [1], [0, 0, 1, 1], [], []>} : vector<16x32xf32>, vector<32x64xf32>, vector<16x64xf32> -> vector<16x64xf32>
    %8 = vector.extract_strided_slice %3 {offsets = [0], sizes = [64], strides = [1]} : vector<256xf32> to vector<64xf32>
    %9 = vector.shape_cast %8 : vector<64xf32> to vector<1x64xf32>
    %10 = vector.broadcast %9 : vector<1x64xf32> to vector<16x64xf32>
    %11 = arith.addf %7, %10 : vector<16x64xf32>
    %12 = vector.extract_strided_slice %0 {offsets = [0, 32], sizes = [16, 32], strides = [1, 1]} : vector<16x128xf32> to vector<16x32xf32>
    %13 = vector.extract_strided_slice %1 {offsets = [1, 0, 0], sizes = [1, 32, 64], strides = [1, 1, 1]} : vector<4x32x64xf32> to vector<1x32x64xf32>
    %14 = vector.shape_cast %13 : vector<1x32x64xf32> to vector<32x64xf32>
    %cst_6 = arith.constant dense<0.000000e+00> : vector<16x64xf32>
    %15 = tpu.matmul %12, %14, %cst_6 {dimension_numbers = #tpu.dot_dimension_numbers<[1], [0], [0], [1], [0, 0, 1, 1], [], []>} : vector<16x32xf32>, vector<32x64xf32>, vector<16x64xf32> -> vector<16x64xf32>
    %16 = vector.extract_strided_slice %3 {offsets = [64], sizes = [64], strides = [1]} : vector<256xf32> to vector<64xf32>
    %17 = vector.shape_cast %16 : vector<64xf32> to vector<1x64xf32>
    %18 = vector.broadcast %17 : vector<1x64xf32> to vector<16x64xf32>
    %19 = arith.addf %15, %18 : vector<16x64xf32>
    %20 = vector.extract_strided_slice %0 {offsets = [0, 64], sizes = [16, 32], strides = [1, 1]} : vector<16x128xf32> to vector<16x32xf32>
    %21 = vector.extract_strided_slice %1 {offsets = [2, 0, 0], sizes = [1, 32, 64], strides = [1, 1, 1]} : vector<4x32x64xf32> to vector<1x32x64xf32>
    %22 = vector.shape_cast %21 : vector<1x32x64xf32> to vector<32x64xf32>
    %cst_7 = arith.constant dense<0.000000e+00> : vector<16x64xf32>
    %23 = tpu.matmul %20, %22, %cst_7 {dimension_numbers = #tpu.dot_dimension_numbers<[1], [0], [0], [1], [0, 0, 1, 1], [], []>} : vector<16x32xf32>, vector<32x64xf32>, vector<16x64xf32> -> vector<16x64xf32>
    %24 = vector.extract_strided_slice %3 {offsets = [128], sizes = [64], strides = [1]} : vector<256xf32> to vector<64xf32>
    %25 = vector.shape_cast %24 : vector<64xf32> to vector<1x64xf32>
    %26 = vector.broadcast %25 : vector<1x64xf32> to vector<16x64xf32>
    %27 = arith.addf %23, %26 : vector<16x64xf32>
    %28 = vector.extract_strided_slice %0 {offsets = [0, 96], sizes = [16, 32], strides = [1, 1]} : vector<16x128xf32> to vector<16x32xf32>
    %29 = vector.extract_strided_slice %1 {offsets = [3, 0, 0], sizes = [1, 32, 64], strides = [1, 1, 1]} : vector<4x32x64xf32> to vector<1x32x64xf32>
    %30 = vector.shape_cast %29 : vector<1x32x64xf32> to vector<32x64xf32>
    %cst_8 = arith.constant dense<0.000000e+00> : vector<16x64xf32>
    %31 = tpu.matmul %28, %30, %cst_8 {dimension_numbers = #tpu.dot_dimension_numbers<[1], [0], [0], [1], [0, 0, 1, 1], [], []>} : vector<16x32xf32>, vector<32x64xf32>, vector<16x64xf32> -> vector<16x64xf32>
    %32 = vector.extract_strided_slice %3 {offsets = [192], sizes = [64], strides = [1]} : vector<256xf32> to vector<64xf32>
    %33 = vector.shape_cast %32 : vector<64xf32> to vector<1x64xf32>
    %34 = vector.broadcast %33 : vector<1x64xf32> to vector<16x64xf32>
    %35 = arith.addf %31, %34 : vector<16x64xf32>
    %36 = tpu.concatenate %11, %19, %27, %35 in 1 : vector<16x64xf32>, vector<16x64xf32>, vector<16x64xf32>, vector<16x64xf32> -> vector<16x256xf32>
    %cst_9 = arith.constant dense<0.000000e+00> : vector<16xf32>
    %37 = vector.multi_reduction <add>, %36, %cst_9 [1] : vector<16x256xf32> to vector<16xf32>
    %38 = vector.shape_cast %37 : vector<16xf32> to vector<16x1xf32>
    %cst_10 = arith.constant 2.560000e+02 : f32
    %39 = vector.broadcast %cst_10 : f32 to vector<16x1xf32>
    %40 = arith.divf %38, %39 : vector<16x1xf32>
    %41 = vector.broadcast %40 : vector<16x1xf32> to vector<16x256xf32>
    %42 = arith.subf %36, %41 : vector<16x256xf32>
    %43 = arith.mulf %42, %42 : vector<16x256xf32>
    %cst_11 = arith.constant dense<0.000000e+00> : vector<16xf32>
    %44 = vector.multi_reduction <add>, %43, %cst_11 [1] : vector<16x256xf32> to vector<16xf32>
    %45 = vector.shape_cast %44 : vector<16xf32> to vector<16x1xf32>
    %cst_12 = arith.constant 2.560000e+02 : f32
    %46 = vector.broadcast %cst_12 : f32 to vector<16x1xf32>
    %47 = arith.divf %45, %46 : vector<16x1xf32>
    %48 = vector.broadcast %40 : vector<16x1xf32> to vector<16x256xf32>
    %49 = arith.subf %36, %48 : vector<16x256xf32>
    %cst_13 = arith.constant 9.99999974E-6 : f32
    %50 = vector.broadcast %cst_13 : f32 to vector<16x1xf32>
    %51 = arith.addf %47, %50 : vector<16x1xf32>
    %52 = math.rsqrt %51 : vector<16x1xf32>
    %53 = vector.broadcast %52 : vector<16x1xf32> to vector<16x256xf32>
    %54 = arith.mulf %49, %53 : vector<16x256xf32>
    %c0_14 = arith.constant 0 : index
    %c0_15 = arith.constant 0 : index
    %55 = vector.load %arg4[%c0_14, %c0_15] : memref<1x256xf32, #tpu.memory_space<vmem>>, vector<1x256xf32>
    %56 = vector.shape_cast %55 : vector<1x256xf32> to vector<256xf32>
    %57 = vector.shape_cast %56 : vector<256xf32> to vector<1x256xf32>
    %58 = vector.broadcast %57 : vector<1x256xf32> to vector<16x256xf32>
    %59 = arith.mulf %54, %58 : vector<16x256xf32>
    %c0_16 = arith.constant 0 : index
    %c0_17 = arith.constant 0 : index
    %60 = vector.load %arg5[%c0_16, %c0_17] : memref<1x256xf32, #tpu.memory_space<vmem>>, vector<1x256xf32>
    %61 = vector.shape_cast %60 : vector<1x256xf32> to vector<256xf32>
    %62 = vector.shape_cast %61 : vector<256xf32> to vector<1x256xf32>
    %63 = vector.broadcast %62 : vector<1x256xf32> to vector<16x256xf32>
    %64 = arith.addf %59, %63 : vector<16x256xf32>
    %c0_18 = arith.constant 0 : index
    %65 = memref.load %arg6[%c0_18] : memref<1xf32, #tpu.memory_space<smem>>
    %cst_19 = arith.constant 0.000000e+00 : f32
    %66 = vector.broadcast %cst_19 : f32 to vector<16x256xf32>
    %67 = arith.cmpf oge, %64, %66 : vector<16x256xf32>
    %68 = vector.broadcast %65 : f32 to vector<16x256xf32>
    %69 = arith.mulf %68, %64 : vector<16x256xf32>
    %70 = arith.select %67, %64, %69 : vector<16x256xi1>, vector<16x256xf32>
    %c0_20 = arith.constant 0 : index
    %c0_21 = arith.constant 0 : index
    %71 = vector.load %arg7[%c0_20, %c0_21] : memref<16x256xf32, #tpu.memory_space<vmem>>, vector<16x256xf32>
    tpu.vector_store %arg7[%c0_20, %c0_21], %70 {strides = array<i32>} : memref<16x256xf32, #tpu.memory_space<vmem>>, vector<16x256xf32>,
    return
  }
  func.func @transform_0(%arg0: i32) -> (i32, i32) {
    %c0_i32 = arith.constant 0 : i32
    %c0_i32_0 = arith.constant 0 : i32
    return %arg0, %c0_i32 : i32, i32
  }
  func.func @transform_1(%arg0: i32) -> (i32, i32, i32) {
    %c0_i32 = arith.constant 0 : i32
    %c0_i32_0 = arith.constant 0 : i32
    %c0_i32_1 = arith.constant 0 : i32
    %c0_i32_2 = arith.constant 0 : i32
    return %c0_i32, %c0_i32_0, %c0_i32_1 : i32, i32, i32
  }
  func.func @transform_2(%arg0: i32) -> (i32, i32) {
    %c0_i32 = arith.constant 0 : i32
    %c0_i32_0 = arith.constant 0 : i32
    %c0_i32_1 = arith.constant 0 : i32
    return %c0_i32, %c0_i32_0 : i32, i32
  }
  func.func @transform_3(%arg0: i32) -> (i32, i32) {
    %c0_i32 = arith.constant 0 : i32
    %c0_i32_0 = arith.constant 0 : i32
    %c0_i32_1 = arith.constant 0 : i32
    return %c0_i32, %c0_i32_0 : i32, i32
  }
  func.func @transform_4(%arg0: i32) -> (i32, i32) {
    %c0_i32 = arith.constant 0 : i32
    %c0_i32_0 = arith.constant 0 : i32
    %c0_i32_1 = arith.constant 0 : i32
    return %c0_i32, %c0_i32_0 : i32, i32
  }
  func.func @transform_5(%arg0: i32) -> i32 {
    %c0_i32 = arith.constant 0 : i32
    %c0_i32_0 = arith.constant 0 : i32
    return %c0_i32 : i32
  }
  func.func @transform_6(%arg0: i32) -> (i32, i32) {
    %c0_i32 = arith.constant 0 : i32
    %c0_i32_0 = arith.constant 0 : i32
    return %arg0, %c0_i32 : i32, i32
  }
}

</mosaic_0001>

<bundles_post_ra>
// kernel: tpu_custom_call.1
= control target key start
LH: loop header
LB: loop body
LE: loop exit
PB: predicated region body
PF: predicated region fallthrough
CT: control target
= control target key end

     0   :  { %12 = vsyncpa [#allocation4], 0  ;;  %s807_s0 = inlined_call_operand.hbm [shape: f32[16,128], index: 0, kind: input, shape index: {}]   ;;  %s808_s1 = inlined_call_operand.hbm [shape: f32[4,32,64], index: 1, kind: input, shape index: {}]   ;;  %s809_s2 = inlined_call_operand.vmem [shape: f32[1,256], index: 2, kind: input, shape index: {}]   ;;  %s810_s3 = inlined_call_operand.vmem [shape: f32[1,256], index: 3, kind: input, shape index: {}]   ;;  %s811_s4 = inlined_call_operand.vmem [shape: f32[1,256], index: 4, kind: input, shape index: {}]   ;;  %s812_s5 = inlined_call_operand.<no memory space> [shape: f32[1], index: 5, kind: input, shape index: {}]   ;;  %s813_s6 = inlined_call_operand.hbm [shape: f32[16,256], index: 6, kind: output, shape index: {}]  }
   0x1   :  { %13 = vsyncpa [#allocation7], 0 }
   0x2   :  { %14 = vsyncpa [#allocation5], 0  ;;  %s704_s21 = smov [#allocation3]  }
   0x3   :  { %s20_s22 = sshll.u32 %s704_s21, 4  ;;  %s21_s22 = int_to_ptr.vmem [resolvable:$true] %s20_s22 }
   0x4   :  { %s646_s23 = scalar_lea.vmem %s21_s22, 256  ;;  %p651_p1 = scmp.lt.s32.totalorder %s21_s22, %s21_s22 }
   0x5   :  { %p647_p0 = scmp.ne.s32.totalorder %s21_s22, %s646_s23  ;;  %p652_p2 = scmp.lt.s32.totalorder %s646_s23, %s646_s23 }
   0x7   :  { %p653_p3 = por %p652_p2, %p651_p1 }
   0x9   :  { %p654_p4 = pnand %p653_p3, %p647_p0 }
   0xb   :  { %657 = shalt.err (!%p654_p4)
}
   0xc   :  { %s705_s24 = smov 128   ;;  %s706_s25 = smov 8  }
   0xd   :  { %26 = dma.hbm_to_vmem [thread:$0]  %s807_s0, 256, %s21_s22, [#allocation4], %s705_s24, %s705_s24, %s706_s25  }
   0xe   :  { %s707_s28 = smov [#allocation6]  }
   0xf   :  { %s32_s29 = sshll.u32 %s707_s28, 4  ;;  %s33_s29 = int_to_ptr.vmem [resolvable:$true] %s32_s29 }
  0x10   :  { %s666_s30 = scalar_lea.vmem %s33_s29, 2048  ;;  %p671_p6 = scmp.lt.s32.totalorder %s33_s29, %s33_s29 }
  0x11   :  { %p667_p5 = scmp.ne.s32.totalorder %s33_s29, %s666_s30  ;;  %p672_p7 = scmp.lt.s32.totalorder %s666_s30, %s666_s30 }
  0x13   :  { %p673_p8 = por %p672_p7, %p671_p6 }
  0x15   :  { %p674_p9 = pnand %p673_p8, %p667_p5 }
  0x17   :  { %677 = shalt.err (!%p674_p9)
}
  0x18   :  { %38 = dma.hbm_to_vmem [thread:$0]  %s808_s1, 2048, %s33_s29, [#allocation7], %s705_s24, %s705_s24, %s706_s25  }
  0x19   :  { %698 = dma.done.wait [#allocation4], 256  }
  0x1a   :  { %699 = vsyncadd [#allocation4], 4294967040 }
  0x1b   :  { %700 = dma.done.wait [#allocation7], 2048  }
  0x1c   :  { %701 = vsyncadd [#allocation7], 4294965248  ;;  %v53_v0 = vld [vmem:[#allocation3] sm:$0xff]  ;;  %v62_v1 = vld [vmem:[#allocation6 + $0x38] sm:$0xff]  ;;  %v73_v2 = vlaneseq  ;;  %s708_s0 = smov 96   ;;  %s709_s9 = smov 32  }
  0x1d   :  { %160 = vrot.lane.b32.xlu0 %v53_v0, %s708_s0  ;;  %343 = vrot.lane.b32.xlu1 %v53_v0, %s709_s9  ;;  %v61_v3 = vld [vmem:[#allocation6 + $0x30] sm:$0xff]  ;;  %vm78_vm0 = vcmask 261120   ;;  %v54_v4 = vld [vmem:[#allocation3 + $0x8] sm:$0xff]  ;;  %v60_v7 = vld [vmem:[#allocation6 + $0x28] sm:$0xff]  ;;  %s710_s11 = smov 64   ;;  %vm442_vm1 = vcmask 523264  }
  0x1e   :  { %591 = vmatprep.subr.mxu1 %v62_v1  ;;  %v755_v5 = vshrl.u32 %v73_v2, 7  ;;  %588 = vmatprep.mubr.msk.f32.mxu0 %vm78_vm0, %v53_v0  ;;  %v58_v6 = vld [vmem:[#allocation6 + $0x18] sm:$0xff]  ;;  %v57_v8 = vld [vmem:[#allocation6 + $0x10] sm:$0xff]  ;;  %v59_v9 = vld [vmem:[#allocation6 + $0x20] sm:$0xff] }
  0x1f   :  { %592 = vmatpush3.msra.mxu1 %v62_v1  ;;  %580 = vmatprep.subr.mxu0 %v58_v6  ;;  %v764_v11 = vld [vmem:[%s809_s2] sm:$0x3]  ;;  %v70_v12 = vld [vmem:[#allocation6 + $0x78] sm:$0xff]  ;;  %v56_v13 = vld [vmem:[#allocation6 + $0x8] sm:$0xff] }
  0x20   :  { %593 = vmatprep.subr.mxu1 %v61_v3  ;;  %v759_v10 = vsub.s32 0, %v755_v5  ;;  %581 = vmatpush3.msra.mxu0 %v58_v6  ;;  %v55_v15 = vld [vmem:[#allocation6] sm:$0xff]  ;;  %v66_v16 = vld [vmem:[#allocation6 + $0x58] sm:$0xff]  ;;  %v65_v17 = vld [vmem:[#allocation6 + $0x50] sm:$0xff]  ;;  %v246_v42 = vrot.slane %v764_v11, 1 }
  0x21   :  { %162 = vrot.lane.b32.xlu0 %v54_v4, %s708_s0  ;;  %345 = vrot.lane.b32.xlu1 %v54_v4, %s709_s9  ;;  %v64_v18 = vld [vmem:[#allocation6 + $0x48] sm:$0xff]  ;;  %v63_v19 = vld [vmem:[#allocation6 + $0x40] sm:$0xff]  ;;  %v69_v23 = vld [vmem:[#allocation6 + $0x70] sm:$0xff] }
  0x22   :  { %594 = vmatpush3.msra.mxu1 %v61_v3  ;;  %582 = vmatprep.subr.mxu0 %v57_v8  ;;  %v770_v14 = vrot.slane %v764_v11, %v759_v10  ;;  %v68_v25 = vld [vmem:[#allocation6 + $0x68] sm:$0xff]  ;;  %v67_v26 = vld [vmem:[#allocation6 + $0x60] sm:$0xff]  ;;  %v250_v44 = vrot.slane %v246_v42, %v759_v10 }
  0x23   :  { %595 = vmatprep.subr.mxu1 %v60_v7  ;;  %583 = vmatpush3.msra.mxu0 %v57_v8 }
  0x24   :  { %596 = vmatpush3.msra.mxu1 %v60_v7  ;;  %584 = vmatprep.subr.mxu0 %v56_v13 }
  0x25   :  { %597 = vmatprep.subr.mxu1 %v59_v9  ;;  %252 = vrot.lane.b32.xlu0 %v53_v0, %s710_s11 }
  0x26   :  { %598 = vmatpush3.msra.mxu1 %v59_v9  ;;  %254 = vrot.lane.b32.xlu1 %v54_v4, %s710_s11 }
  0x27   :  { %613 = vmatprep.subr.mxu1 %v70_v12  ;;  %585 = vmatpush3.msra.mxu0 %v56_v13 }
  0x28   :  { %586 = vmatprep.subr.mxu0 %v55_v15 }
  0x29   :  { %335 = vrot.lane.b32.xlu0 %v764_v11, %s710_s11  ;;  %587 = vmatpush3.msra.mxu0 %v55_v15 }
  0x2a   :  { %164 = vrot.lane.b32.xlu1 %v770_v14, %s710_s11  ;;  %602 = vmatprep.subr.mxu0 %v66_v16 }
  0x2b   :  { %589 = vmatmul.mubr.msk.f32.vlgmr.msra.gmra.mxu0 %vm78_vm0, %v54_v4 }
  0x2c   :  { %603 = vmatpush3.msra.mxu0 %v66_v16 }
  0x2d   :  { %604 = vmatprep.subr.mxu0 %v65_v17 }
  0x2e   :  { %605 = vmatpush3.msra.mxu0 %v65_v17 }
  0x2f   :  { %606 = vmatprep.subr.mxu0 %v64_v18 }
  0x30   :  { %607 = vmatpush3.msra.mxu0 %v64_v18 }
  0x31   :  { %608 = vmatprep.subr.mxu0 %v63_v19 }
  0x32   :  { %609 = vmatpush3.msra.mxu0 %v63_v19  ;;  %v488_v19 = vsub.s32 1, %v755_v5 }
  0x8f   :  { %v161_v20 = vpop.permute.xlu0 %160  ;;  %v344_v21 = vpop.permute.xlu1 %343 }
  0x90   :  { %599 = vmatprep.mubr.msk.f32.mxu1 %vm78_vm0, %v161_v20  ;;  %v480_v20 = vld [vmem:[%s810_s3] sm:$0x3]  ;;  %s711_s3 = smov [#allocation8]  }
  0x93   :  { %v163_v22 = vpop.permute.xlu0 %162  ;;  %v346_v24 = vpop.permute.xlu1 %345 }
  0x94   :  { %600 = vmatmul.mubr.msk.f32.vlgmr.msra.gmra.mxu1 %vm78_vm0, %v163_v22  ;;  %v485_v22 = vrot.slane %v480_v20, %v759_v10 }
  0x95   :  { %614 = vmatpush3.msra.mxu1 %v70_v12  ;;  %621 = vmatprep.mubr.msk.f32.mxu1 %vm78_vm0, %v344_v21  ;;  %v496_v21 = vld [vmem:[%s811_s4] sm:$0x3]  ;;  %s535_s4 = sshll.u32 %s711_s3, 4  ;;  %s536_s4 = int_to_ptr.vmem [resolvable:$true] %s535_s4 }
  0x96   :  { %615 = vmatprep.subr.mxu1 %v69_v23  ;;  %p683_p11 = scmp.lt.s32.totalorder %s536_s4, %s536_s4 }
  0x97   :  { %616 = vmatpush3.msra.mxu1 %v69_v23  ;;  %v253_v27 = vpop.permute.xlu0 %252  ;;  %v489_v23 = vrot.slane %v480_v20, %v488_v19 }
  0x98   :  { %617 = vmatprep.subr.mxu1 %v68_v25  ;;  %v255_v28 = vpop.permute.xlu1 %254  ;;  %610 = vmatprep.mubr.msk.f32.mxu0 %vm78_vm0, %v253_v27 }
  0x99   :  { %618 = vmatpush3.msra.mxu1 %v68_v25  ;;  %611 = vmatmul.mubr.msk.f32.vlgmr.msra.gmra.mxu0 %vm78_vm0, %v255_v28  ;;  %v501_v25 = vrot.slane %v496_v21, %v759_v10 }
  0x9a   :  { %619 = vmatprep.subr.mxu1 %v67_v26 }
  0x9b   :  { %620 = vmatpush3.msra.mxu1 %v67_v26  ;;  %v336_v30 = vpop.permute.xlu0 %335  ;;  %v505_v26 = vrot.slane %v496_v21, %v488_v19 }
  0x9c   :  { %622 = vmatmul.mubr.msk.f32.vlgmr.msra.gmra.mxu1 %vm78_vm0, %v346_v24  ;;  %v165_v29 = vpop.permute.xlu1 %164  ;;  %v337_v33 = vrot.slane %v336_v30, 1 }
  0x9e   :  { %v341_v36 = vrot.slane %v337_v33, %v759_v10 }
  0xeb   :  { %v590_v41 = vpop.f32.mrf.mxu0 }
  0xec   :  { %v157_v47 = vadd.f32 %v590_v41, %v770_v14 }
  0xed   :  { %v151_v43 = vpop.f32.mrf.mxu0 }
  0xee   :  { %v152_v52 = vadd.f32 %v151_v43, %v770_v14 }
 0x154   :  { %v601_v31 = vpop.f32.mrf.mxu1 }
 0x155   :  { %v243_v32 = vadd.f32 %v601_v31, %v165_v29  ;;  %v517_v31 = vstv %s812_s5  ;;  %s678_s5 = scalar_lea.vmem %s536_s4, 512 }
 0x156   :  { %v237_v34 = vpop.f32.mrf.mxu1  ;;  %p679_p10 = scmp.ne.s32.totalorder %s536_s4, %s678_s5  ;;  %p684_p12 = scmp.lt.s32.totalorder %s678_s5, %s678_s5 }
 0x157   :  { %v238_v35 = vadd.f32 %v237_v34, %v165_v29  ;;  %430 = vrot.lane.b32.xlu1 %v243_v32, %s710_s11 }
 0x158   :  { %p685_p13 = por %p684_p12, %p683_p11 }
 0x159   :  { %428 = vrot.lane.b32.xlu0 %v238_v35, %s710_s11  ;;  %v612_v45 = vpop.f32.mrf.mxu0 }
 0x15a   :  { %v332_v48 = vadd.f32 %v612_v45, %v250_v44  ;;  %p686_p0 = pnand %p685_p13, %p679_p10 }
 0x15b   :  { %v326_v50 = vpop.f32.mrf.mxu0 }
 0x15c   :  { %v623_v37 = vpop.f32.mrf.mxu1  ;;  %v327_v54 = vadd.f32 %v326_v50, %v250_v44 }
 0x15d   :  { %v423_v38 = vadd.f32 %v623_v37, %v341_v36 }
 0x15e   :  { %v417_v39 = vpop.f32.mrf.mxu1 }
 0x15f   :  { %v418_v40 = vadd.f32 %v417_v39, %v341_v36  ;;  %438 = vrot.lane.b32.xlu1 %v423_v38, %s710_s11 }
 0x161   :  { %436 = vrot.lane.b32.xlu0 %v418_v40, %s710_s11 }
 0x1c9   :  { %v431_v46 = vpop.permute.xlu1 %430 }
 0x1ca   :  { %v444_v53 = vsel %vm442_vm1, %v157_v47, %v431_v46 }
 0x1cb   :  { %v429_v49 = vpop.permute.xlu0 %428 }
 0x1cc   :  { %v443_v58 = vsel %vm442_vm1, %v152_v52, %v429_v49 }
 0x1d1   :  { %v439_v51 = vpop.permute.xlu1 %438 }
 0x1d2   :  { %v446_v55 = vsel %vm442_vm1, %v332_v48, %v439_v51 }
 0x1d3   :  { %v437_v56 = vpop.permute.xlu0 %436  ;;  %v450_v57 = vadd.f32 %v446_v55, %v444_v53 }
 0x1d4   :  { %v445_v59 = vsel %vm442_vm1, %v327_v54, %v437_v56 }
 0x1d5   :  { %451 = vadd.xlane.f32.xlu1 %v450_v57  ;;  %v447_v60 = vadd.f32 %v445_v59, %v443_v58 }
 0x1d7   :  { %448 = vadd.xlane.f32.xlu0 %v447_v60 }
 0x25e   :  { %v452_v61 = vpop.xlane.xlu1 %451 }
 0x25f   :  { %v455_v62 = vmul.f32 0.00390625, %v452_v61 }
 0x260   :  { %v449_v63 = vpop.xlane.xlu0 %448 }
 0x261   :  { %v454_v0 = vmul.f32 0.00390625, %v449_v63  ;;  %v458_v1 = vsub.f32 %v444_v53, %v455_v62  ;;  %v459_v2 = vsub.f32 %v446_v55, %v455_v62 }
 0x263   :  { %v456_v3 = vsub.f32 %v443_v58, %v454_v0  ;;  %v457_v4 = vsub.f32 %v445_v59, %v454_v0  ;;  %v462_v9 = vmul.f32 %v458_v1, %v458_v1  ;;  %v463_v11 = vmul.f32 %v459_v2, %v459_v2 }
 0x265   :  { %v460_v6 = vmul.f32 %v456_v3, %v456_v3  ;;  %v461_v7 = vmul.f32 %v457_v4, %v457_v4  ;;  %v467_v12 = vadd.f32 %v463_v11, %v462_v9 }
 0x267   :  { %v464_v8 = vadd.f32 %v461_v7, %v460_v6 }
 0x269   :  { %465 = vadd.xlane.f32.xlu0 %v464_v8 }
 0x26d   :  { %468 = vadd.xlane.f32.xlu0 %v467_v12 }
 0x2f2   :  { %v466_v13 = vpop.xlane.xlu0 %465 }
 0x2f3   :  { %v470_v14 = vmul.f32 0.00390625, %v466_v13 }
 0x2f5   :  { %v472_v15 = vadd.f32 1e-05, %v470_v14 }
 0x2f6   :  { %v469_v16 = vpop.xlane.xlu0 %468 }
 0x2f7   :  { %634 = vrsqrt.f32 %v472_v15  ;;  %v471_v17 = vmul.f32 0.00390625, %v469_v16 }
 0x2f9   :  { %v473_v18 = vadd.f32 1e-05, %v471_v17 }
 0x2fb   :  { %636 = vrsqrt.f32 %v473_v18 }
 0x304   :  { %v635_v24 = vpop.eup %634 }
 0x305   :  { %v476_v27 = vmul.f32 %v635_v24, %v456_v3  ;;  %v477_v28 = vmul.f32 %v635_v24, %v457_v4 }
 0x307   :  { %v492_v29 = vmul.f32 %v485_v22, %v476_v27  ;;  %v493_v30 = vmul.f32 %v489_v23, %v477_v28 }
 0x308   :  { %v637_v5 = vpop.eup %636 }
 0x309   :  { %v508_v32 = vadd.f32 %v501_v25, %v492_v29  ;;  %v509_v33 = vadd.f32 %v505_v26, %v493_v30  ;;  %v478_v34 = vmul.f32 %v637_v5, %v458_v1  ;;  %v479_v35 = vmul.f32 %v637_v5, %v459_v2 }
 0x30b   :  { %v494_v36 = vmul.f32 %v485_v22, %v478_v34  ;;  %v495_v37 = vmul.f32 %v489_v23, %v479_v35  ;;  %vm513_vm2 = vcmp.ge.f32.partialorder %v508_v32, 0.0  ;;  %vm514_vm3 = vcmp.ge.f32.partialorder %v509_v33, 0.0 }
 0x30c   :  { %v518_v38 = vmul.f32 %v517_v31, %v508_v32  ;;  %v519_v10 = vmul.f32 %v517_v31, %v509_v33 }
 0x30d   :  { %v510_v39 = vadd.f32 %v501_v25, %v494_v36  ;;  %v511_v40 = vadd.f32 %v505_v26, %v495_v37 }
 0x30e   :  { %v522_v41 = vsel %vm513_vm2, %v508_v32, %v518_v38  ;;  %v523_v42 = vsel %vm514_vm3, %v509_v33, %v519_v10 }
 0x30f   :  { %vm515_vm4 = vcmp.ge.f32.partialorder %v510_v39, 0.0  ;;  %vm516_vm5 = vcmp.ge.f32.partialorder %v511_v40, 0.0  ;;  %v520_v43 = vmul.f32 %v517_v31, %v510_v39  ;;  %v521_v44 = vmul.f32 %v517_v31, %v511_v40  ;;  %526 = vst [vmem:[#allocation8] sm:$0xff] %v522_v41  ;;  %527 = vst [vmem:[#allocation8 + $0x8] sm:$0xff] %v523_v42 }
 0x311   :  { %v524_v45 = vsel %vm515_vm4, %v510_v39, %v520_v43  ;;  %v525_v46 = vsel %vm516_vm5, %v511_v40, %v521_v44 }
 0x312   :  { %528 = vst [vmem:[#allocation8 + $0x10] sm:$0xff] %v524_v45  ;;  %529 = vst [vmem:[#allocation8 + $0x18] sm:$0xff] %v525_v46 }
 0x313   :  { %689 = shalt.err (!%p686_p0)
}
 0x314   :  { %s712_s17 = smov 256   ;;  %s713_s18 = smov 16  }
 0x315   :  { %541 = dma.vmem_to_hbm [thread:$0]  %s536_s4, 512, %s813_s6, [#allocation5], %s712_s17, %s712_s17, %s713_s18  }
 0x316   :  { %702 = dma.done.wait [#allocation5], 512  }
 0x317   :  { %703 = vsyncadd [#allocation5], 4294966784 }
 0x318   :  { %545 = vsyncpa [#allocation4], 1 }
 0x319   :  { %546 = vsyncpa [#allocation7], 1 }
 0x31a   :  { %547 = vsyncpa [#allocation5], 1 }

</bundles_post_ra>
